<compile_context>
chip_gen: v7x
topology: tpu7x:2x2x1
jax: 0.10.0
libtpu: 0.0.40
codegen_flags: <defaults>
</compile_context>

<pallas_src>
import jax
import jax.numpy as jnp
from jax.experimental import pallas as pl
from jax.experimental.pallas import tpu as pltpu


# --------------------------------------------------------------------------
# Kernels
# --------------------------------------------------------------------------
def _onehot_gather_kernel(ids_ref, table_ref, out_ref):
    """Gather T rows from a VMEM-resident table via a one-hot MXU matmul.

    ids_ref:   (T, 1) int32 token ids for this tile.
    table_ref: (V, D) embedding table (resident across all grid steps).
    out_ref:   (T, D) output tile.
    """
    ids = ids_ref[...]                                   # (T, 1)
    tbl = table_ref[...]                                 # (V, D)
    t = ids.shape[0]
    v = tbl.shape[0]
    cols = jax.lax.broadcasted_iota(jnp.int32, (t, v), dimension=1)
    one_hot = (cols == ids).astype(tbl.dtype)            # (T, V), exactly 0/1
    # Accumulate in f32 on the MXU. With exactly one 1.0 per row this is a
    # pure row-select; rounding only comes from the MXU's bf16-pass handling
    # of the f32 table values (see tolerance note in __main__).
    out_ref[...] = jnp.dot(
        one_hot, tbl, preferred_element_type=jnp.float32
    ).astype(out_ref.dtype)


def _loop_gather_kernel(ids_smem, table_ref, out_ref):
    """Gather T rows from a VMEM-resident table, one dynamic row copy each.

    Used when V is too large for the one-hot matmul to be worthwhile but the
    table still fits in VMEM.  ids_smem is the full flat id vector prefetched
    into SMEM (scalar prefetch).
    """
    t = out_ref.shape[0]
    base = pl.program_id(0) * t

    def body(j, carry):
        row_idx = ids_smem[base + j]
        out_ref[pl.ds(j, 1), :] = table_ref[pl.ds(row_idx, 1), :]
        return carry

    jax.lax.fori_loop(0, t, body, 0)


def _rowgather_hbm_kernel(ids_ref, row_ref, out_ref):
    """Fallback: one embedding row per grid step, chosen by the index_map."""
    del ids_ref
    out_ref[...] = row_ref[...]


# --------------------------------------------------------------------------
# Wrapper
# --------------------------------------------------------------------------
def _round_up(x: int, m: int) -> int:
    return ((x + m - 1) // m) * m


def embedding_lookup(table: jax.Array, feature: jax.Array,
                     *, tile_tokens: int = 256,
                     onehot_max_vocab: int = 2048) -> jax.Array:
    """Pallas embedding gather.

    table:   (V, D) embedding matrix (padding row already zeroed).
             float32 by default; bfloat16 also supported (halves HBM/VMEM).
    feature: (B, S) int token ids.
    returns: (B, S, D) embeddings in table.dtype.
    """
    B, S = feature.shape
    V, D = table.shape
    N = B * S

    itemsize = jnp.dtype(table.dtype).itemsize
    sublane = max(8, 32 // max(itemsize, 1))     # 8 for f32, 16 for bf16

    # Token-tile size: multiple of the sublane packing, capped at tile_tokens.
    T = min(_round_up(tile_tokens, sublane), _round_up(N, sublane))
    num_tiles = pl.cdiv(N, T)
    N_pad = num_tiles * T

    flat_ids = feature.reshape(N).astype(jnp.int32)
    if N_pad != N:
        # Tail slots point at row 0; their output rows are sliced off below.
        flat_ids = jnp.pad(flat_ids, (0, N_pad - N))

    # ---- VMEM budgeting (v7x has 64 MiB/TC vs 128 MiB on v5e/v6e) ----------
    try:
        vmem_cap = int(pltpu.get_tpu_info().vmem_capacity_bytes)
    except Exception:
        vmem_cap = 64 * 1024 * 1024              # conservative (v7x per-TC)
    table_bytes = V * D * itemsize
    out_tile_bytes = T * D * itemsize
    resident_need = (2 * table_bytes            # table (budget double buffer)
                     + 2 * out_tile_bytes       # double-buffered output tiles
                     + 2 * T * 4                # id tiles
                     + (1 << 20))               # slack
    resident_ok = resident_need <= int(0.75 * vmem_cap)
    vmem_limit = int(min(vmem_cap, max(resident_need + (8 << 20), 32 << 20)))

    if resident_ok and V <= onehot_max_vocab:
        # -------- resident table + one-hot MXU gather (small vocab) --------
        ids2d = flat_ids.reshape(N_pad, 1)
        out = pl.pallas_call(
            _onehot_gather_kernel,
            out_shape=jax.ShapeDtypeStruct((N_pad, D), table.dtype),
            grid_spec=pltpu.PrefetchScalarGridSpec(
                num_scalar_prefetch=0,
                grid=(num_tiles,),
                in_specs=[
                    pl.BlockSpec((T, 1), lambda i: (i, 0)),   # token-id tile
                    pl.BlockSpec((V, D), lambda i: (0, 0)),   # table, resident
                ],
                out_specs=pl.BlockSpec((T, D), lambda i: (i, 0)),
            ),
            compiler_params=pltpu.CompilerParams(
                dimension_semantics=("parallel",),
                vmem_limit_bytes=vmem_limit,
            ),
        )(ids2d, table)
    elif resident_ok:
        # -------- resident table + per-row dynamic copies (large vocab) ----
        # flat ids are scalar-prefetched into SMEM (fine up to ~256K tokens).
        out = pl.pallas_call(
            _loop_gather_kernel,
            out_shape=jax.ShapeDtypeStruct((N_pad, D), table.dtype),
            grid_spec=pltpu.PrefetchScalarGridSpec(
                num_scalar_prefetch=1,
                grid=(num_tiles,),
                in_specs=[pl.BlockSpec((V, D), lambda i, ids: (0, 0))],
                out_specs=pl.BlockSpec((T, D), lambda i, ids: (i, 0)),
            ),
            compiler_params=pltpu.CompilerParams(
                dimension_semantics=("parallel",),
                vmem_limit_bytes=vmem_limit,
            ),
        )(flat_ids, table)
    else:
        # -------- table does not fit VMEM: per-row BlockSpec gather --------
        # TODO(synk): replace with a manual-DMA gather (table in pl.ANY,
        # pltpu.make_async_copy with 8-16 row DMAs in flight per (T, D) tile).
        out = pl.pallas_call(
            _rowgather_hbm_kernel,
            out_shape=jax.ShapeDtypeStruct((N_pad, D), table.dtype),
            grid_spec=pltpu.PrefetchScalarGridSpec(
                num_scalar_prefetch=1,
                grid=(N_pad,),
                in_specs=[pl.BlockSpec((1, D), lambda i, ids: (ids[i], 0))],
                out_specs=pl.BlockSpec((1, D), lambda i, ids: (i, 0)),
            ),
            compiler_params=pltpu.CompilerParams(
                dimension_semantics=("arbitrary",),
            ),
        )(flat_ids, table)

    return out[:N].reshape(B, S, D)


def make_embedding_table(key, vocab_size: int, pretrain_dim: int,
                         pad_index: int | None = 0,
                         dtype=jnp.float32) -> jax.Array:
    # Deterministic stand-in for the pretrained-embedding loading: small
    # random init (np.random.normal(0, 1e-4, ...) semantics) with the padding
    # row zeroed, as nn.Embedding(padding_idx=...) would keep it.
    # TODO(synk): the .npz pretrained vectors / vocab.json remap is file IO
    # and is not reproduced here; rows are filled with deterministic randoms.
    table = (1e-4 * jax.random.normal(key, (vocab_size, pretrain_dim),
                                      dtype=jnp.float32)).astype(dtype)
    if pad_index is not None:
        table = table.at[pad_index, :].set(0)
    return table


if __name__ == "__main__":
    key = jax.random.PRNGKey(0)
    k_tab, k_ids = jax.random.split(key)

    vocab_size = 64
    pretrain_dim = 128
    pad_index = 0
    batch, seq = 2, 8

    table = make_embedding_table(k_tab, vocab_size, pretrain_dim, pad_index)
    feature = jax.random.randint(k_ids, (batch, seq), 0, vocab_size,
                                 dtype=jnp.int32)
    # Force a few padding tokens to exercise the zero row.
    feature = feature.at[0, 0].set(pad_index).at[1, -1].set(pad_index)

    emb = jax.block_until_ready(embedding_lookup(table, feature))

    # Reference check (plain JAX gather).
    ref = jnp.take(table, feature, axis=0)
    assert emb.shape == (batch, seq, pretrain_dim)
    assert emb.dtype == table.dtype
    # The one-hot gather runs on the MXU, which may use bf16-pass precision
    # for f32 operands under the default precision setting; the select itself
    # is exact, so only table-value rounding (<= ~2^-8 relative) can appear.
    assert jnp.allclose(emb, ref, rtol=1e-2, atol=1e-8), \
        "Pallas embedding gather mismatch"
    # Padding rows must be exactly zero (1.0 * 0.0 contributions only).
    assert jnp.all(emb[0, 0] == 0.0) and jnp.all(emb[1, -1] == 0.0)

    print("KERNEL_OK")
</pallas_src>

<mosaic_0001>
module attributes {stable_mosaic.version = 11 : i64} {
  func.func @_onehot_gather_kernel(%arg0: i32, %arg1: memref<16x1xi32, #tpu.memory_space<vmem>>, %arg2: memref<64x128xf32, #tpu.memory_space<vmem>>, %arg3: memref<16x128xf32, #tpu.memory_space<vmem>>) attributes {dimension_semantics = [#tpu.dimension_semantics<parallel>], iteration_bounds = array<i64: 1>, scalar_prefetch = 0 : i64, scratch_operands = 0 : i64, tpu.core_type = #tpu.core_type<tc>, window_params = [{transform_indices = @transform_0, window_bounds = array<i64: 16, 1>}, {pipeline_mode = #tpu.pipeline_mode<synchronous>, transform_indices = @transform_1, window_bounds = array<i64: 64, 128>}, {transform_indices = @transform_2, window_bounds = array<i64: 16, 128>}]} {
    %c0 = arith.constant 0 : index
    %c0_0 = arith.constant 0 : index
    %0 = vector.load %arg1[%c0, %c0_0] : memref<16x1xi32, #tpu.memory_space<vmem>>, vector<16x1xi32>
    %c0_1 = arith.constant 0 : index
    %c0_2 = arith.constant 0 : index
    %1 = vector.load %arg2[%c0_1, %c0_2] : memref<64x128xf32, #tpu.memory_space<vmem>>, vector<64x128xf32>
    %2 = tpu.iota {dimensions = array<i32: 1>} : vector<16x64xi32>
    %3 = vector.broadcast %0 : vector<16x1xi32> to vector<16x64xi32>
    %4 = arith.cmpi eq, %2, %3 : vector<16x64xi32>
    %5 = arith.extui %4 : vector<16x64xi1> to vector<16x64xi32>
    %6 = arith.sitofp %5 : vector<16x64xi32> to vector<16x64xf32>
    %cst = arith.constant dense<0.000000e+00> : vector<16x128xf32>
    %7 = tpu.matmul %6, %1, %cst {dimension_numbers = #tpu.dot_dimension_numbers<[1], [0], [0], [1], [0, 0, 1, 1], [], []>} : vector<16x64xf32>, vector<64x128xf32>, vector<16x128xf32> -> vector<16x128xf32>
    %c0_3 = arith.constant 0 : index
    %c0_4 = arith.constant 0 : index
    %8 = vector.load %arg3[%c0_3, %c0_4] : memref<16x128xf32, #tpu.memory_space<vmem>>, vector<16x128xf32>
    tpu.vector_store %arg3[%c0_3, %c0_4], %7 {strides = array<i32>} : memref<16x128xf32, #tpu.memory_space<vmem>>, vector<16x128xf32>,
    return
  }
  func.func @transform_0(%arg0: i32) -> (i32, i32) {
    %c0_i32 = arith.constant 0 : i32
    %c0_i32_0 = arith.constant 0 : i32
    return %arg0, %c0_i32 : i32, i32
  }
  func.func @transform_1(%arg0: i32) -> (i32, i32) {
    %c0_i32 = arith.constant 0 : i32
    %c0_i32_0 = arith.constant 0 : i32
    %c0_i32_1 = arith.constant 0 : i32
    return %c0_i32, %c0_i32_0 : i32, i32
  }
  func.func @transform_2(%arg0: i32) -> (i32, i32) {
    %c0_i32 = arith.constant 0 : i32
    %c0_i32_0 = arith.constant 0 : i32
    return %arg0, %c0_i32 : i32, i32
  }
}

</mosaic_0001>

<bundles_post_ra>
// kernel: tpu_custom_call.1
= control target key start
LH: loop header
LB: loop body
LE: loop exit
PB: predicated region body
PF: predicated region fallthrough
CT: control target
= control target key end

     0   :  { %7 = vsyncpa [#allocation3], 0  ;;  %s312_s0 = inlined_call_operand.vmem [shape: s32[16,1], index: 0, kind: input, shape index: {}]   ;;  %s313_s1 = inlined_call_operand.hbm [shape: f32[64,128], index: 1, kind: input, shape index: {}]   ;;  %s314_s2 = inlined_call_operand.hbm [shape: f32[16,128], index: 2, kind: output, shape index: {}]  }
   0x1   :  { %8 = vsyncpa [#allocation4], 0  ;;  %s255_s9 = smov [#allocation2]   ;;  %s207_s13 = scalar_lea.hbm %s313_s1, 1024 }
   0x2   :  { %s16_s10 = sshll.u32 %s255_s9, 4  ;;  %p208_p0 = scmp.ne.s32.totalorder %s313_s1, %s207_s13  ;;  %s17_s10 = int_to_ptr.vmem [resolvable:$true] %s16_s10 }
   0x3   :  { %p211_p1 = scmp.lt.u32.totalorder %s207_s13, %s313_s1 }
   0x5   :  { %p213_p2 = pnand %p211_p1, %p208_p0 }
   0x7   :  { %216 = shalt.err (!%p213_p2)
}
   0x8   :  { %s217_s18 = scalar_lea.vmem %s17_s10, 1024  ;;  %p222_p4 = scmp.lt.s32.totalorder %s17_s10, %s17_s10 }
   0x9   :  { %p218_p3 = scmp.ne.s32.totalorder %s17_s10, %s217_s18  ;;  %p223_p5 = scmp.lt.s32.totalorder %s217_s18, %s217_s18 }
   0xb   :  { %p224_p6 = por %p223_p5, %p222_p4 }
   0xd   :  { %p225_p7 = pnand %p224_p6, %p218_p3 }
   0xf   :  { %228 = shalt.err (!%p225_p7)
}
  0x10   :  { %s256_s19 = smov 128   ;;  %s257_s20 = smov 8  }
  0x11   :  { %22 = dma.hbm_to_vmem [thread:$0]  %s313_s1, 1024, %s17_s10, [#allocation3], %s256_s19, %s256_s19, %s257_s20  }
  0x12   :  { %251 = dma.done.wait [#allocation3], 1024  }
  0x13   :  { %252 = vsyncadd [#allocation3], 4294966272  ;;  %v258_v0 = vmov 0   ;;  %v26_v1 = vld [vmem:[%s312_s0] sm:$0xff]  ;;  %v29_v3 = vld [vmem:[#allocation2 + $0x8] sm:$0xff]  ;;  %v36_v15 = vlaneseq  ;;  %vm50_vm0 = vcmask 523264  }
  0x14   :  { %206 = vset.pattern.permute.xlu0 %v258_v0  ;;  %v28_v2 = vld [vmem:[#allocation2] sm:$0xff]  ;;  %v30_v4 = vld [vmem:[#allocation2 + $0x10] sm:$0xff]  ;;  %v31_v5 = vld [vmem:[#allocation2 + $0x18] sm:$0xff]  ;;  %v259_v18 = vmov 0.0  }
  0x15   :  { %39 = vperm.xlu0 %206, %v26_v1   ;;  %v27_v6 = vld [vmem:[%s312_s0 + $0x8] sm:$0xff]  ;;  %v184_v7 = vpack.c.bf16 %v29_v3, %v28_v2  ;;  %v188_v8 = vpack.c.bf16 %v31_v5, %v30_v4  ;;  %v32_v9 = vld [vmem:[#allocation2 + $0x20] sm:$0xff]  ;;  %v34_v12 = vld [vmem:[#allocation2 + $0x30] sm:$0xff]  ;;  %v37_v16 = vand.u32 127, %v36_v15  ;;  %s260_s0 = smov [#allocation5]  }
  0x16   :  { %v33_v10 = vld [vmem:[#allocation2 + $0x28] sm:$0xff]  ;;  %v35_v13 = vld [vmem:[#allocation2 + $0x38] sm:$0xff]  ;;  %s139_s1 = sshll.u32 %s260_s0, 4  ;;  %s140_s1 = int_to_ptr.vmem [resolvable:$true] %s139_s1 }
  0x17   :  { %185 = vmatprep.subr.bf16.mxu0 %v184_v7  ;;  %v192_v11 = vpack.c.bf16 %v33_v10, %v32_v9  ;;  %v196_v14 = vpack.c.bf16 %v35_v13, %v34_v12  ;;  %s229_s27 = scalar_lea.vmem %s140_s1, 256  ;;  %p234_p9 = scmp.lt.s32.totalorder %s140_s1, %s140_s1 }
  0x18   :  { %187 = vmatpush3.bf16.msra.mxu0 %v184_v7  ;;  %p230_p8 = scmp.ne.s32.totalorder %s140_s1, %s229_s27  ;;  %p235_p10 = scmp.lt.s32.totalorder %s229_s27, %s229_s27 }
  0x19   :  { %42 = vperm.xlu0 %206, %v27_v6   ;;  %189 = vmatprep.subr.bf16.mxu0 %v188_v8 }
  0x1a   :  { %p236_p11 = por %p235_p10, %p234_p9 }
  0x1c   :  { %191 = vmatpush3.bf16.msra.mxu0 %v188_v8  ;;  %p237_p12 = pnand %p236_p11, %p230_p8 }
  0x1d   :  { %193 = vmatprep.subr.bf16.mxu0 %v192_v11 }
  0x20   :  { %195 = vmatpush3.bf16.msra.mxu0 %v192_v11 }
  0x21   :  { %197 = vmatprep.subr.bf16.mxu0 %v196_v14 }
  0x24   :  { %199 = vmatpush3.bf16.msra.mxu0 %v196_v14 }
  0x94   :  { %v40_v17 = vpop.permute.xlu0 %39 }
  0x95   :  { %vm44_vm1 = vcmp.eq.s32.totalorder %v37_v16, %v40_v17 }
  0x96   :  { %v151_v19 = vsel %vm44_vm1, 1.0, %v259_v18 }
  0x97   :  { %181 = vmatprep.mubr.msk.f32.mxu0 %vm50_vm0, %v151_v19 }
  0x98   :  { %v43_v20 = vpop.permute.xlu0 %42 }
  0x99   :  { %vm45_vm2 = vcmp.eq.s32.totalorder %v37_v16, %v43_v20 }
  0x9a   :  { %v152_v21 = vsel %vm45_vm2, 1.0, %v259_v18 }
  0x9b   :  { %182 = vmatmul.mubr.msk.f32.vlgmr.msra.gmra.mrb[0].mxu0 %vm50_vm0, %v152_v21 }
 0x16e   :  { %v183_v22 = vpop.f32.mrb[0].mxu0 }
 0x16f   :  { %133 = vst [vmem:[#allocation5 + $0x8] sm:$0xff] %v183_v22  ;;  %v123_v23 = vpop.f32.mrb[1].mxu0 }
 0x170   :  { %132 = vst [vmem:[#allocation5] sm:$0xff] %v123_v23 }
 0x171   :  { %240 = shalt.err (!%p237_p12)
}
 0x172   :  { %s241_s30 = scalar_lea.hbm %s314_s2, 256 }
 0x173   :  { %p242_p13 = scmp.ne.s32.totalorder %s314_s2, %s241_s30  ;;  %p245_p0 = scmp.lt.u32.totalorder %s241_s30, %s314_s2 }
 0x175   :  { %p247_p1 = pnand %p245_p0, %p242_p13 }
 0x177   :  { %250 = shalt.err (!%p247_p1)
}
 0x178   :  { %145 = dma.vmem_to_hbm [thread:$0]  %s140_s1, 256, %s314_s2, [#allocation4], %s256_s19, %s256_s19, %s257_s20  }
 0x179   :  { %253 = dma.done.wait [#allocation4], 256  }
 0x17a   :  { %254 = vsyncadd [#allocation4], 4294967040 }
 0x17b   :  { %149 = vsyncpa [#allocation3], 1 }
 0x17c   :  { %150 = vsyncpa [#allocation4], 1 }

</bundles_post_ra>
